<compile_context>
chip_gen: v7x
topology: tpu7x:2x2x1
jax: 0.10.0
libtpu: 0.0.40
codegen_flags: <defaults>
</compile_context>

<pallas_src>
import functools

import jax
import jax.numpy as jnp
from jax import lax
from jax.experimental import pallas as pl
from jax.experimental.pallas import tpu as pltpu


COMPUTE_DTYPE = jnp.bfloat16          # MXU-native storage / matmul dtype
VMEM_LIMIT_BYTES = 48 * 1024 * 1024   # below v7x 64 MiB physical; above v5e/v6e defaults


# ----------------------------------------------------------------------------
# small helpers
# ----------------------------------------------------------------------------

def _round_up(x, m):
    return (x + m - 1) // m * m


def _vocab_tiling(vocab_size):
    """(vocab tile, padded vocab) for the MLM logits kernel (lane-dense stores)."""
    vt = 2048 if vocab_size > 2048 else _round_up(vocab_size, 128)
    return vt, _round_up(vocab_size, vt)


def _const_spec(shape):
    """Full-array block with a constant index map (weights / small tensors)."""
    zeros = (0,) * len(shape)
    return pl.BlockSpec(shape, lambda *_: zeros)


def _layer_norm_f32(x, w, b, eps=1e-5):
    mu = jnp.mean(x, axis=-1, keepdims=True)
    xc = x - mu
    var = jnp.mean(xc * xc, axis=-1, keepdims=True)
    return xc * lax.rsqrt(var + eps) * w + b


# ----------------------------------------------------------------------------
# Pallas kernels
# ----------------------------------------------------------------------------

def embed_add_kernel(tok_ref, seg_ref, pos_ref, out_ref):
    # tok/seg/pos/out blocks: (S, H); pos is broadcast over batch via its index map.
    out_ref[...] = (tok_ref[...] + seg_ref[...] + pos_ref[...]).astype(out_ref.dtype)


def encoder_layer_kernel(x_ref, mask_ref,
                         wqkv_ref, bqkv_ref, wo_ref, bo_ref,
                         ln1w_ref, ln1b_ref,
                         w1_ref, b1_ref, w2_ref, b2_ref,
                         ln2w_ref, ln2b_ref,
                         out_ref, *, num_head):
    """One post-norm nn.TransformerEncoderLayer (ReLU FFN) for one batch row.

    x_ref / out_ref: (S, H) blocks (batch dim squeezed by the BlockSpec);
    mask_ref: (1, S) float32 (1.0 == pad); weights pre-transposed to x @ W layout.
    """
    S, H = x_ref.shape
    hd = H // num_head
    scale = 1.0 / float(hd) ** 0.5
    cdt = x_ref.dtype                                                  # bf16

    x = x_ref[...]                                                     # (S, H)
    # key_padding_mask: 1.0 -> masked key gets a large negative score (added once).
    neg = jnp.where(mask_ref[...] > 0.5, -1e9, 0.0)                    # (1, S) f32

    # --- fused QKV projection: one (S,H) @ (H,3H) MXU matmul, f32 accumulation ---
    qkv = jnp.dot(x, wqkv_ref[...],
                  preferred_element_type=jnp.float32) + bqkv_ref[...]  # (S, 3H) f32

    # split heads -> (num_head, S, hd); 1/sqrt(hd) folded into Q with ONE multiply
    q = jnp.transpose((qkv[:, :H] * scale).reshape(S, num_head, hd), (1, 0, 2)).astype(cdt)
    k = jnp.transpose(qkv[:, H:2 * H].reshape(S, num_head, hd), (1, 0, 2)).astype(cdt)
    v = jnp.transpose(qkv[:, 2 * H:].reshape(S, num_head, hd), (1, 0, 2)).astype(cdt)

    # --- batched-head attention (MXU), softmax statistics in f32 ---
    s = jnp.einsum('hqd,hkd->hqk', q, k,
                   preferred_element_type=jnp.float32)                 # (nh, S, S)
    s = s + neg                                                        # mask over keys
    s = s - jnp.max(s, axis=-1, keepdims=True)
    p = jnp.exp(s)
    p = p * pl.reciprocal(jnp.sum(p, axis=-1, keepdims=True), approx=True)

    ctx = jnp.einsum('hqk,hkd->hqd', p.astype(cdt), v,
                     preferred_element_type=jnp.float32)               # (nh, S, hd)
    ctx = jnp.transpose(ctx, (1, 0, 2)).reshape(S, H).astype(cdt)      # concat heads

    # single (S,H) @ (H,H) output projection
    attn = jnp.dot(ctx, wo_ref[...], preferred_element_type=jnp.float32) + bo_ref[...]

    # --- add & norm 1 ---
    y = _layer_norm_f32(x.astype(jnp.float32) + attn, ln1w_ref[...], ln1b_ref[...])

    # --- feed-forward (ReLU) ---
    # TODO(synk): for BERT-base on v7x (64 MiB VMEM), stream w1/w2 in F-tiles via an
    # extra grid axis (or pltpu.emit_pipeline) and prefetch next-layer weights,
    # instead of keeping the whole FFN weights resident.
    h1 = jnp.maximum(
        jnp.dot(y.astype(cdt), w1_ref[...], preferred_element_type=jnp.float32)
        + b1_ref[...], 0.0)
    ff = jnp.dot(h1.astype(cdt), w2_ref[...],
                 preferred_element_type=jnp.float32) + b2_ref[...]

    # --- add & norm 2 ---
    out_ref[...] = _layer_norm_f32(y + ff, ln2w_ref[...], ln2b_ref[...]).astype(out_ref.dtype)


def nsp_kernel(cls_ref, w1_ref, b1_ref, w2_ref, b2_ref, out_ref):
    # Linear(H->128) -> tanh -> Linear(128->2); weights pre-transposed.
    h = jnp.tanh(jnp.dot(cls_ref[...], w1_ref[...],
                         preferred_element_type=jnp.float32) + b1_ref[...])
    out_ref[...] = (jnp.dot(h.astype(w2_ref.dtype), w2_ref[...],
                            preferred_element_type=jnp.float32)
                    + b2_ref[...]).astype(out_ref.dtype)


def mlm_kernel(tok_ref, w1_ref, b1_ref, lnw_ref, lnb_ref, w2_ref, b2_ref, out_ref):
    # Linear(H->128) -> ReLU -> LayerNorm(128) -> Linear(128 -> vocab tile).
    # The tiny hidden path is recomputed per vocab tile (negligible vs. the logits matmul).
    h = jnp.maximum(
        jnp.dot(tok_ref[...], w1_ref[...], preferred_element_type=jnp.float32)
        + b1_ref[...], 0.0)
    hn = _layer_norm_f32(h, lnw_ref[...], lnb_ref[...]).astype(w2_ref.dtype)
    out_ref[...] = (jnp.dot(hn, w2_ref[...], preferred_element_type=jnp.float32)
                    + b2_ref[...]).astype(out_ref.dtype)


# ----------------------------------------------------------------------------
# Wrappers (pallas_call plumbing)
# ----------------------------------------------------------------------------

def embed_add(tok, seg, pos, out_dtype):
    B, S, H = tok.shape
    row = pl.BlockSpec((None, S, H), lambda b: (b, 0, 0))
    return pl.pallas_call(
        embed_add_kernel,
        out_shape=jax.ShapeDtypeStruct((B, S, H), out_dtype),
        grid=(B,),
        in_specs=[row, row,
                  pl.BlockSpec((None, S, H), lambda b: (0, 0, 0))],   # pos broadcast
        out_specs=row,
        compiler_params=pltpu.CompilerParams(dimension_semantics=("parallel",)),
    )(tok, seg, pos)


def encoder_layer(x, mask3, lp, num_head):
    B, S, H = x.shape
    F = lp["w1t"].shape[1]
    kernel = functools.partial(encoder_layer_kernel, num_head=num_head)
    row = pl.BlockSpec((None, S, H), lambda b: (b, 0, 0))
    return pl.pallas_call(
        kernel,
        out_shape=jax.ShapeDtypeStruct((B, S, H), x.dtype),
        grid=(B,),
        in_specs=[
            row,                                                # x: per-batch block
            pl.BlockSpec((None, 1, S), lambda b: (b, 0, 0)),    # mask row (1, S)
            _const_spec((H, 3 * H)), _const_spec((1, 3 * H)),
            _const_spec((H, H)), _const_spec((1, H)),
            _const_spec((1, H)), _const_spec((1, H)),
            _const_spec((H, F)), _const_spec((1, F)),
            _const_spec((F, H)), _const_spec((1, H)),
            _const_spec((1, H)), _const_spec((1, H)),
        ],
        out_specs=row,
        compiler_params=pltpu.CompilerParams(
            dimension_semantics=("parallel",),     # batch axis -> megacore on v7x
            vmem_limit_bytes=VMEM_LIMIT_BYTES),
    )(x, mask3, lp["wqkvt"], lp["bqkv"], lp["wot"], lp["bo"],
      lp["ln1w"], lp["ln1b"], lp["w1t"], lp["b1"], lp["w2t"], lp["b2"],
      lp["ln2w"], lp["ln2b"])


def nsp_head(cls_tok, p):
    B = cls_tok.shape[0]
    return pl.pallas_call(
        nsp_kernel,
        out_shape=jax.ShapeDtypeStruct((B, 2), jnp.float32),
    )(cls_tok, p["w1t"], p["b1"], p["w2t"], p["b2"])


def mlm_head(masked_tokens, p, vocab_size):
    N, H = masked_tokens.shape
    vt, vp = _vocab_tiling(vocab_size)
    logits = pl.pallas_call(
        mlm_kernel,
        out_shape=jax.ShapeDtypeStruct((N, vp), jnp.float32),
        grid=(vp // vt,),
        in_specs=[
            _const_spec((N, H)),
            _const_spec((H, 128)), _const_spec((1, 128)),
            _const_spec((1, 128)), _const_spec((1, 128)),
            pl.BlockSpec((128, vt), lambda j: (0, j)),          # stream vocab tiles
            pl.BlockSpec((1, vt), lambda j: (0, j)),
        ],
        out_specs=pl.BlockSpec((N, vt), lambda j: (0, j)),
        compiler_params=pltpu.CompilerParams(
            dimension_semantics=("parallel",),
            vmem_limit_bytes=VMEM_LIMIT_BYTES),
    )(masked_tokens, p["w1t"], p["b1"], p["lnw"], p["lnb"], p["w2t"], p["b2"])
    return logits[:, :vocab_size]


# ----------------------------------------------------------------------------
# Parameter init (deterministic, synthetic; pre-transposed x @ W layout, bf16)
# ----------------------------------------------------------------------------

def init_params(vocab_size, hidden_size, max_len, num_head, ffn_hidden_size,
                num_blocks, seed=0, compute_dtype=COMPUTE_DTYPE):
    key = jax.random.PRNGKey(seed)
    counter = [0]

    def nrm(shape, scale=0.02, dtype=compute_dtype):
        counter[0] += 1
        k = jax.random.fold_in(key, counter[0])
        return (scale * jax.random.normal(k, shape, jnp.float32)).astype(dtype)

    def zeros(shape):
        return jnp.zeros(shape, jnp.float32)

    def ones(shape):
        return jnp.ones(shape, jnp.float32)

    H, F = hidden_size, ffn_hidden_size
    _, vp = _vocab_tiling(vocab_size)

    # MLM output projection: (128, vocab) pre-transposed and zero-padded to a
    # multiple of the vocab tile so stores stay lane-dense (padding sliced off later).
    w2_mlm = jnp.pad(nrm((128, vocab_size), dtype=jnp.float32),
                     ((0, 0), (0, vp - vocab_size))).astype(compute_dtype)

    params = {
        "token_emb": nrm((vocab_size, H), 0.05, jnp.float32),
        "seg_emb": nrm((2, H), 0.05, jnp.float32),
        "pos_emb": nrm((1, max_len, H), 0.05, jnp.float32),
        "layers": [],
        "nsp": {
            "w1t": nrm((H, 128)), "b1": zeros((1, 128)),
            "w2t": nrm((128, 2)), "b2": zeros((1, 2)),
        },
        "mlm": {
            "w1t": nrm((H, 128)), "b1": zeros((1, 128)),
            "lnw": ones((1, 128)), "lnb": zeros((1, 128)),
            "w2t": w2_mlm, "b2": zeros((1, vp)),
        },
    }
    for _ in range(num_blocks):
        params["layers"].append({
            # all weights stored as W.T (x @ W layout), bf16; biases/LN in f32
            "wqkvt": nrm((H, 3 * H)), "bqkv": zeros((1, 3 * H)),
            "wot": nrm((H, H)), "bo": zeros((1, H)),
            "ln1w": ones((1, H)), "ln1b": zeros((1, H)),
            "w1t": nrm((H, F)), "b1": zeros((1, F)),
            "w2t": nrm((F, H)), "b2": zeros((1, H)),
            "ln2w": ones((1, H)), "ln2b": zeros((1, H)),
        })
    return params


# ----------------------------------------------------------------------------
# Full BERT forward
# ----------------------------------------------------------------------------

def bert_forward(params, sentences, segments, padding_mask, masked_indices,
                 mlm_mask, *, num_head):
    B, S = sentences.shape
    vocab_size = params["token_emb"].shape[0]
    cdt = params["layers"][0]["wqkvt"].dtype

    # Embedding gathers are glue (XLA gather); the add + cast runs in Pallas.
    tok = jnp.take(params["token_emb"], sentences, axis=0)    # (B, S, H) f32
    seg = jnp.take(params["seg_emb"], segments, axis=0)       # (B, S, H) f32
    pos = params["pos_emb"][:, :S, :]                         # (1, S, H) f32
    x = embed_add(tok, seg, pos, cdt)                         # (B, S, H) bf16

    # Encoder stack: one pallas_call per layer, per-batch blocks, parallel batch axis.
    mask3 = padding_mask.astype(jnp.float32)[:, None, :]      # (B, 1, S); 1.0 == pad
    for lp in params["layers"]:
        x = encoder_layer(x, mask3, lp, num_head)

    # NSP head on the CLS token.
    cls_tok = x[:, 0, :]                                      # (B, H)
    nsp = nsp_head(cls_tok, params["nsp"])                    # (B, 2) f32

    # MLM head on gathered masked tokens (gather is glue).
    Bm, M = masked_indices.shape
    index0 = jnp.repeat(jnp.arange(Bm), M)
    masked_tokens = x[index0, masked_indices.reshape(-1)]     # (B*M, H) bf16
    mlm = mlm_head(masked_tokens, params["mlm"], vocab_size)  # (B*M, vocab) f32

    return {"nsp": nsp, "mlm": mlm, "mlm_mask": mlm_mask}


# ----------------------------------------------------------------------------

if __name__ == "__main__":
    VOCAB, HIDDEN, MAX_LEN = 64, 32, 16
    NUM_HEAD, FFN_HIDDEN, NUM_BLOCKS = 4, 64, 2
    B, S, M = 2, 8, 3

    params = init_params(VOCAB, HIDDEN, MAX_LEN, NUM_HEAD, FFN_HIDDEN,
                         NUM_BLOCKS, seed=0)

    key = jax.random.PRNGKey(0)
    k1, k2, k3, k4 = jax.random.split(key, 4)
    sentences = jax.random.randint(k1, (B, S), 0, VOCAB, jnp.int32)
    segments = jax.random.randint(k2, (B, S), 0, 2, jnp.int32)
    # last positions padded (True == ignore), never a fully-padded row
    padding_mask = jnp.array(
        [[False] * 6 + [True] * 2,
         [False] * 7 + [True] * 1], dtype=jnp.bool_)
    masked_indices = jax.random.randint(k3, (B, M), 0, S - 2, jnp.int32)
    mlm_mask = jax.random.bernoulli(k4, 0.7, (B, M))

    out = bert_forward(params, sentences, segments, padding_mask,
                       masked_indices, mlm_mask, num_head=NUM_HEAD)
    out = jax.block_until_ready(out)

    assert out["nsp"].shape == (B, 2)
    assert out["mlm"].shape == (B * M, VOCAB)
    assert out["mlm_mask"].shape == (B, M)
    assert bool(jnp.all(jnp.isfinite(out["nsp"])))
    assert bool(jnp.all(jnp.isfinite(out["mlm"])))
    print("KERNEL_OK")
</pallas_src>

<mosaic_0001>
module attributes {stable_mosaic.version = 11 : i64} {
  func.func @embed_add_kernel(%arg0: i32, %arg1: memref<1x8x32xf32, #tpu.memory_space<vmem>>, %arg2: memref<1x8x32xf32, #tpu.memory_space<vmem>>, %arg3: memref<1x8x32xf32, #tpu.memory_space<vmem>>, %arg4: memref<1x8x32xbf16, #tpu.memory_space<vmem>>) attributes {dimension_semantics = [#tpu.dimension_semantics<parallel>], iteration_bounds = array<i64: 2>, scalar_prefetch = 0 : i64, scratch_operands = 0 : i64, tpu.core_type = #tpu.core_type<tc>, window_params = [{transform_indices = @transform_0, window_bounds = array<i64: 1, 8, 32>}, {transform_indices = @transform_1, window_bounds = array<i64: 1, 8, 32>}, {pipeline_mode = #tpu.pipeline_mode<synchronous>, transform_indices = @transform_2, window_bounds = array<i64: 1, 8, 32>}, {transform_indices = @transform_3, window_bounds = array<i64: 1, 8, 32>}]} {
    %c0 = arith.constant 0 : index
    %c0_0 = arith.constant 0 : index
    %c0_1 = arith.constant 0 : index
    %0 = vector.load %arg1[%c0, %c0_0, %c0_1] : memref<1x8x32xf32, #tpu.memory_space<vmem>>, vector<1x8x32xf32>
    %1 = vector.shape_cast %0 : vector<1x8x32xf32> to vector<8x32xf32>
    %c0_2 = arith.constant 0 : index
    %c0_3 = arith.constant 0 : index
    %c0_4 = arith.constant 0 : index
    %2 = vector.load %arg2[%c0_2, %c0_3, %c0_4] : memref<1x8x32xf32, #tpu.memory_space<vmem>>, vector<1x8x32xf32>
    %3 = vector.shape_cast %2 : vector<1x8x32xf32> to vector<8x32xf32>
    %4 = arith.addf %1, %3 : vector<8x32xf32>
    %c0_5 = arith.constant 0 : index
    %c0_6 = arith.constant 0 : index
    %c0_7 = arith.constant 0 : index
    %5 = vector.load %arg3[%c0_5, %c0_6, %c0_7] : memref<1x8x32xf32, #tpu.memory_space<vmem>>, vector<1x8x32xf32>
    %6 = vector.shape_cast %5 : vector<1x8x32xf32> to vector<8x32xf32>
    %7 = arith.addf %4, %6 : vector<8x32xf32>
    %8 = arith.truncf %7 : vector<8x32xf32> to vector<8x32xbf16>
    %c0_8 = arith.constant 0 : index
    %c0_9 = arith.constant 0 : index
    %c0_10 = arith.constant 0 : index
    %9 = vector.load %arg4[%c0_8, %c0_9, %c0_10] : memref<1x8x32xbf16, #tpu.memory_space<vmem>>, vector<1x8x32xbf16>
    %10 = vector.shape_cast %9 : vector<1x8x32xbf16> to vector<8x32xbf16>
    %11 = vector.shape_cast %8 : vector<8x32xbf16> to vector<1x8x32xbf16>
    tpu.vector_store %arg4[%c0_8, %c0_9, %c0_10], %11 {strides = array<i32>} : memref<1x8x32xbf16, #tpu.memory_space<vmem>>, vector<1x8x32xbf16>,
    return
  }
  func.func @transform_0(%arg0: i32) -> (i32, i32, i32) {
    %c0_i32 = arith.constant 0 : i32
    %c0_i32_0 = arith.constant 0 : i32
    %c0_i32_1 = arith.constant 0 : i32
    return %arg0, %c0_i32, %c0_i32_0 : i32, i32, i32
  }
  func.func @transform_1(%arg0: i32) -> (i32, i32, i32) {
    %c0_i32 = arith.constant 0 : i32
    %c0_i32_0 = arith.constant 0 : i32
    %c0_i32_1 = arith.constant 0 : i32
    return %arg0, %c0_i32, %c0_i32_0 : i32, i32, i32
  }
  func.func @transform_2(%arg0: i32) -> (i32, i32, i32) {
    %c0_i32 = arith.constant 0 : i32
    %c0_i32_0 = arith.constant 0 : i32
    %c0_i32_1 = arith.constant 0 : i32
    %c0_i32_2 = arith.constant 0 : i32
    return %c0_i32, %c0_i32_0, %c0_i32_1 : i32, i32, i32
  }
  func.func @transform_3(%arg0: i32) -> (i32, i32, i32) {
    %c0_i32 = arith.constant 0 : i32
    %c0_i32_0 = arith.constant 0 : i32
    %c0_i32_1 = arith.constant 0 : i32
    return %arg0, %c0_i32, %c0_i32_0 : i32, i32, i32
  }
}

</mosaic_0001>

<bundles_post_ra>
// kernel: tpu_custom_call.1
= control target key start
LH: loop header
LB: loop body
LE: loop exit
PB: predicated region body
PF: predicated region fallthrough
CT: control target
= control target key end

     0   :  { %8 = vsyncpa [#allocation3], 0  ;;  %s862_s0 = inlined_call_operand.hbm [shape: f32[2,8,32], index: 0, kind: input, shape index: {}]   ;;  %s863_s1 = inlined_call_operand.hbm [shape: f32[2,8,32], index: 1, kind: input, shape index: {}]   ;;  %s864_s2 = inlined_call_operand.hbm [shape: f32[1,8,32], index: 2, kind: input, shape index: {}]   ;;  %s865_s3 = inlined_call_operand.hbm [shape: bf16[2,8,32], index: 3, kind: output, shape index: {}]  }
   0x1   :  { %10 = vsyncpa [#allocation3 + $0x1], 0 }
   0x2   :  { %11 = vsyncpa [#allocation6], 0 }
   0x3   :  { %13 = vsyncpa [#allocation6 + $0x1], 0 }
   0x4   :  { %14 = vsyncpa [#allocation4], 0 }
   0x5   :  { %16 = vsyncpa [#allocation4 + $0x1], 0  ;;  %s626_s12 = smov 0   ;;  %s628_s13 = smov 0  }
   0x6   :  { %s630_s14 = smov 0   ;;  %s632_s15 = smov 0  }
   0x7 LB: > { %s647_s16 = sadd.s32 4294967295, %s600_s15   ;;  %s359_s17 = sadd.s32 4294967294, %s600_s15   ;;  %s600_s15 = sphi %s632_s15, %s891_s15   ;;  %s596_s14 = sphi %s630_s14, %s890_s14   ;;  %s592_s13 = sphi %s628_s13, %s889_s13   ;;  %s588_s12 = sphi %s626_s12, %s888_s12  }
   0x8   : > { %p42_p0 = scmp.ne.s32.totalorder %s592_s13, %s588_s12  ;;  %p866_p1 = scmp.eq.s32.totalorder %s647_s16, 0 }
   0x9   : > { %p119_p3 = scmp.eq.s32.totalorder %s359_s17, 1  ;;  %p360_p5 = scmp.ge.s32.totalorder %s600_s15, 1 }
   0xa   : > { %p656_p4 = por %p866_p1, %p42_p0  ;;  %p126_p7 = scmp.lt.s32.totalorder %s600_s15, 3 }
   0xb   : > { %p661_p6 = por %p119_p3, %p42_p0  ;;  %s602_s21 = smov [#allocation7]  }
   0xc   : > { %s870_s18 = scalar_select %p656_p4, 1, 0 }
   0xd   : > { %s871_s19 = scalar_select %p661_p6, 1, 0 }
   0xe   : > { %p666_p8 = pnand %p360_p5, %p126_p7  ;;  %s139_s22 = sshll.u32 %s602_s21, 4  ;;  %s140_s22 = int_to_ptr.vmem [resolvable:$true] %s139_s22 }
   0xf   : > { %s674_s23 = sadd.s32 1, %s600_s15   ;;  %s29_s27 = sadd.s32 1, %s596_s14 }
  0x10   : > { %s872_s20 = scalar_select %p666_p8, 1, 0 }
  0x11   : > { %p386_p10 = pneg %p666_p8  ;;  %s26_s25 = ssub.s32 %s600_s15, %s674_s23 }
  0x12   : > { %p684_p12 = scmp.eq.s32.totalorder %s26_s25, 0  ;;  %s438_s30 = scalar_lea.hbm %s864_s2, 128 }
  0x13   : > { %p678_p11 = pnand %p386_p10, %p866_p1  ;;  %p439_p0 = scmp.ne.s32.totalorder %s864_s2, %s438_s30 }
  0x14   : > { %s874_s26 = scalar_select %p684_p12, 1, 0 }
  0x15   : > { %p440_p3 = pneg %p678_p11  ;;  %p445_p10 = scmp.lt.u32.totalorder %s438_s30, %s864_s2 }
  0x17   : > { %p441_p5 = pnand %p440_p3, %p439_p0 }
  0x19   : > { %p442_p7 = pneg %p441_p5 }
  0x1b   : > { %p447_p9 = pnand %p445_p10, %p442_p7 }
  0x1d   : > { %450 = shalt.err (!%p447_p9)
}
  0x1e   : > { %s451_s8 = scalar_lea.vmem %s140_s22, 128  ;;  %p459_p6 = scmp.lt.s32.totalorder %s140_s22, %s140_s22 }
  0x1f   : > { %p452_p1 = scmp.ne.s32.totalorder %s140_s22, %s451_s8  ;;  %p460_p4 = scmp.lt.s32.totalorder %s451_s8, %s451_s8 }
  0x21   : > { %p454_p2 = pnand %p452_p1, %p440_p3  ;;  %p461_p8 = por %p460_p4, %p459_p6 }
  0x23   : > { %p455_p13 = pneg %p454_p2 }
  0x25   : > { %p462_p12 = pnand %p461_p8, %p455_p13 }
  0x27   : > { %465 = shalt.err (!%p462_p12)
}
  0x28   : > { %389 = dma.hbm_to_vmem [thread:$0]  (!%p678_p11), %s864_s2, 128, %s140_s22, [#allocation6]  }
  0x29   : > { %p875_p1 = scmp.ne.s32.totalorder %s874_s26, 0  ;;  %p37_p2 = scmp.eq.s32.totalorder %s600_s15, 0 }
  0x2a   : > { %p876_p4 = scmp.ne.s32.totalorder %s596_s14, %s592_s13  ;;  %p877_p6 = scmp.eq.s32.totalorder %s647_s16, 1 }
  0x2b   : > { %s710_s11 = scalar_select %p875_p1, %s596_s14, %s29_s27  }
  0x2c   : > { %p718_p8 = por %p877_p6, %p876_p4  ;;  %p402_p9 = scmp.lt.s32.totalorder %s600_s15, 2 }
  0x2d   : > { %s150_s21 = sand.u32 1, %s596_s14   ;;  %p879_p12 = pmov %p876_p4 }
  0x2e   : > { %s878_s17 = scalar_select %p718_p8, 1, 0 }
  0x2f   : > { %p38_p13 = por %p37_p2, %p879_p12  ;;  %s727_s24 = sshll.u32 %s150_s21, 3 }
  0x30   : > { %s364_s25 = sshll.u32 %s600_s15, 7  ;;  %s154_s27 = scalar_lea.vmem [#allocation2], %s727_s24 }
  0x31   : > { %s733_s26 = scalar_lea.hbm %s862_s0, %s364_s25  ;;  %s161_s29 = sshll.u32 %s154_s27, 4  ;;  %s740_s29 = int_to_ptr.vmem [resolvable:$true] %s161_s29 }
  0x32   : > { %p736_p11 = pnand %p402_p9, %p38_p13  ;;  %s745_s6 = scalar_lea.hbm %s863_s1, %s364_s25 }
  0x33   : > { %s151_s7 = scalar_lea.sflag [#allocation3], %s150_s21  ;;  %s466_s8 = scalar_lea.hbm %s733_s26, 128 }
  0x34   : > { %p467_p0 = scmp.ne.s32.totalorder %s733_s26, %s466_s8  ;;  %p468_p3 = pneg %p736_p11 }
  0x35   : > { %s471_s28 = scalar_lea.hbm %s862_s0, 256  ;;  %p472_p10 = scmp.lt.u32.totalorder %s733_s26, %s862_s0 }
  0x36   : > { %p469_p5 = pnand %p468_p3, %p467_p0  ;;  %p473_p1 = scmp.lt.u32.totalorder %s471_s28, %s466_s8 }
  0x37   : > { %p475_p4 = scmp.lt.u32.totalorder %s466_s8, %s733_s26 }
  0x38   : > { %p470_p7 = pneg %p469_p5  ;;  %p474_p2 = por %p473_p1, %p472_p10 }
  0x3a   : > { %p476_p6 = por %p475_p4, %p474_p2 }
  0x3c   : > { %p477_p9 = pnand %p476_p6, %p470_p7 }
  0x3e   : > { %480 = shalt.err (!%p477_p9)
}
  0x3f   : > { %s481_s21 = scalar_lea.vmem %s740_s29, 128  ;;  %s603_s25 = smov [#allocation2]  }
  0x40   : > { %p482_p12 = scmp.ne.s32.totalorder %s740_s29, %s481_s21  ;;  %s486_s4 = sshll.u32 %s603_s25, 4  ;;  %s487_s4 = int_to_ptr.vmem [resolvable:$false] %s486_s4 }
  0x41   : > { %s488_s5 = scalar_lea.vmem %s487_s4, 256  ;;  %p489_p5 = scmp.lt.s32.totalorder %s740_s29, %s487_s4 }
  0x42   : > { %p484_p13 = pnand %p482_p12, %p468_p3  ;;  %p490_p10 = scmp.lt.s32.totalorder %s488_s5, %s481_s21 }
  0x44   : > { %p485_p0 = pneg %p484_p13  ;;  %p491_p1 = por %p490_p10, %p489_p5 }
  0x46   : > { %p492_p2 = pnand %p491_p1, %p485_p0 }
  0x48   : > { %495 = shalt.err (!%p492_p2)
}
  0x49   : > { %393 = dma.hbm_to_vmem [thread:$0]  (!%p736_p11), %s733_s26, 128, %s740_s29, %s151_s7  }
  0x4a   : > { %s168_s8 = sand.u32 1, %s600_s15   ;;  %s172_s9 = scalar_lea.vmem [#allocation5], %s727_s24 }
  0x4b   : > { %s179_s10 = sshll.u32 %s172_s9, 4  ;;  %s169_s28 = scalar_lea.sflag [#allocation6], %s168_s8  ;;  %s180_s10 = int_to_ptr.vmem [resolvable:$true] %s179_s10 }
  0x4c   : > { %s496_s22 = scalar_lea.hbm %s745_s6, 128  ;;  %s501_s25 = scalar_lea.hbm %s863_s1, 256 }
  0x4d   : > { %p497_p7 = scmp.ne.s32.totalorder %s745_s6, %s496_s22  ;;  %p502_p9 = scmp.lt.u32.totalorder %s745_s6, %s863_s1 }
  0x4e   : > { %p503_p12 = scmp.lt.u32.totalorder %s501_s25, %s496_s22  ;;  %p505_p0 = scmp.lt.u32.totalorder %s496_s22, %s745_s6 }
  0x4f   : > { %p499_p4 = pnand %p497_p7, %p468_p3 }
  0x50   : > { %p504_p13 = por %p503_p12, %p502_p9 }
  0x51   : > { %p500_p6 = pneg %p499_p4 }
  0x52   : > { %p506_p5 = por %p505_p0, %p504_p13 }
  0x54   : > { %p507_p10 = pnand %p506_p5, %p500_p6 }
  0x56   : > { %510 = shalt.err (!%p507_p10)
}
  0x57   : > { %s511_s24 = scalar_lea.vmem %s180_s10, 128  ;;  %s604_s26 = smov [#allocation5]  }
  0x58   : > { %p512_p1 = scmp.ne.s32.totalorder %s180_s10, %s511_s24  ;;  %s516_s29 = sshll.u32 %s604_s26, 4  ;;  %s517_s29 = int_to_ptr.vmem [resolvable:$false] %s516_s29 }
  0x59   : > { %s518_s7 = scalar_lea.vmem %s517_s29, 256  ;;  %p519_p4 = scmp.lt.s32.totalorder %s180_s10, %s517_s29 }
  0x5a   : > { %p514_p2 = pnand %p512_p1, %p468_p3  ;;  %p520_p8 = scmp.lt.s32.totalorder %s518_s7, %s511_s24 }
  0x5c   : > { %p515_p7 = pneg %p514_p2  ;;  %p521_p9 = por %p520_p8, %p519_p4 }
  0x5e   : > { %p522_p12 = pnand %p521_p9, %p515_p7 }
  0x60   : > { %525 = shalt.err (!%p522_p12)
}
  0x61   : > { %396 = dma.hbm_to_vmem [thread:$0]  (!%p736_p11), %s745_s6, 128, %s180_s10, %s169_s28  }
  0x62   : > { %p881_p6 = scmp.ne.s32.totalorder %s872_s20, 0 }
  0x63   : > { %s796_s8 = sand.u32 (!%p881_p6), 1, %s592_s13   ;;  %p882_p3 = scmp.ne.s32.totalorder (!%p881_p6), %s870_s18, 0 }
  0x64   : > { %188 = sbr.rel (%p881_p6) target bundleno = 140 (0x8c), region = 32  ;;  %s368_s9 = sshll.u32 (!%p881_p6), %s796_s8, 3 }
  0x65   : > { %s191_s22 = scalar_lea.sflag (!%p881_p6), [#allocation3], %s796_s8  ;;  %s194_s27 = scalar_lea.vmem (!%p881_p6), [#allocation2], %s368_s9 }
  0x6b   : > { %571 = dma.done.wait (%p882_p3), %s191_s22, 128  }
  0x6c   : > { %573 = vsyncadd (%p882_p3), %s191_s22, 4294967168  ;;  %s199_s30 = sand.u32 1, %s647_s16   ;;  %s203_s20 = scalar_lea.vmem [#allocation5], %s368_s9 }
  0x6d   : > { %s200_s6 = scalar_lea.sflag [#allocation6], %s199_s30 }
  0x6e   : > { %575 = dma.done.wait (%p882_p3), %s200_s6, 128  }
  0x6f   : > { %577 = vsyncadd (%p882_p3), %s200_s6, 4294967168  ;;  %p883_p8 = scmp.eq.s32.totalorder %s647_s16, 0 }
  0x71   : > { %579 = dma.done.wait (%p883_p8), [#allocation6], 128   ;;  %p884_p11 = pmov %p883_p8 }
  0x72   : > { %s371_s10 = sshll.u32 %s796_s8, 2  ;;  %v235_v0 = vld [vmem:[%s194_s27] sm:$0xff]  ;;  %v236_v1 = vld [vmem:[%s203_s20] sm:$0xff]  ;;  %s373_s25 = sshll.u32 %s647_s16, 6  ;;  %vm241_vm0 = vcmask 257024  }
  0x73   : > { %581 = vsyncadd (%p884_p11), [#allocation6], 4294967168  ;;  %v238_v2 = vld [vmem:[#allocation7] sm:$0xff]  ;;  %v237_v3 = vadd.f32 %v236_v1, %v235_v0  ;;  %s234_s28 = scalar_lea.vmem [#allocation8], %s371_s10  ;;  %s820_s5 = scalar_lea.hbm %s865_s3, %s373_s25 }
  0x74   : > { %s257_s21 = sshll.u32 %s234_s28, 4  ;;  %s244_s24 = scalar_lea.sflag [#allocation4], %s796_s8  ;;  %s815_s21 = int_to_ptr.vmem [resolvable:$true] %s257_s21 }
  0x75   : > { %v239_v4 = vadd.f32 %v238_v2, %v237_v3  ;;  %s526_s26 = scalar_lea.vmem %s815_s21, 64  ;;  %p885_p0 = scmp.ne.s32.totalorder %s878_s17, 0 }
  0x76   : > { %p527_p13 = scmp.ne.s32.totalorder %s815_s21, %s526_s26  ;;  %s605_s16 = smov [#allocation8]  }
  0x77   : > { %v240_v5 = vpack.c.bf16 %v239_v4, %v239_v4  ;;  %s530_s29 = sshll.u32 %s605_s16, 4  ;;  %s531_s29 = int_to_ptr.vmem [resolvable:$false] %s530_s29 }
  0x78   : > { %p528_p5 = pnand %p527_p13, %p885_p0  ;;  %s532_s7 = scalar_lea.vmem %s531_s29, 128 }
  0x79   : > { %242 = vst.msk [vmem:[%s234_s28] sm:$0xf] %vm241_vm0, %v240_v5  ;;  %p533_p1 = scmp.lt.s32.totalorder %s815_s21, %s531_s29  ;;  %p534_p2 = scmp.lt.s32.totalorder %s532_s7, %s526_s26 }
  0x7a   : > { %p529_p10 = pneg %p528_p5 }
  0x7b   : > { %p535_p7 = por %p534_p2, %p533_p1 }
  0x7d   : > { %p536_p4 = pnand %p535_p7, %p529_p10 }
  0x7f   : > { %539 = shalt.err (!%p536_p4)
}
  0x80   : > { %s540_s8 = scalar_lea.hbm %s820_s5, 64  ;;  %s544_s27 = scalar_lea.hbm %s865_s3, 128 }
  0x81   : > { %p541_p9 = scmp.ne.s32.totalorder %s820_s5, %s540_s8  ;;  %p545_p3 = scmp.lt.u32.totalorder %s820_s5, %s865_s3 }
  0x82   : > { %p546_p8 = scmp.lt.u32.totalorder %s544_s27, %s540_s8  ;;  %p548_p13 = scmp.lt.u32.totalorder %s540_s8, %s820_s5 }
  0x83   : > { %p542_p12 = pnand %p541_p9, %p885_p0 }
  0x84   : > { %p547_p11 = por %p546_p8, %p545_p3 }
  0x85   : > { %p543_p6 = pneg %p542_p12 }
  0x86   : > { %p549_p5 = por %p548_p13, %p547_p11 }
  0x88   : > { %p550_p10 = pnand %p549_p5, %p543_p6 }
  0x8a   : > { %553 = shalt.err (!%p550_p10)
}
  0x8b   : > { %384 = dma.vmem_to_hbm [thread:$0]  (%p885_p0), %s815_s21, 64, %s820_s5, %s244_s24  }
  0x8c PF: > { %s269_s20 = sand.u32 1, %s588_s12   ;;  %p886_p1 = scmp.ne.s32.totalorder %s871_s19, 0 }
  0x8d   : > { %p887_p2 = scmp.ge.s32.totalorder %s600_s15, 2  ;;  %s270_s10 = scalar_lea.sflag [#allocation4], %s269_s20 }
  0x8f   : > { %p398_p7 = pnand %p887_p2, %p886_p1 }
  0x91   : > { %583 = dma.done.wait (!%p398_p7), %s270_s10, 64  }
  0x92   : > { %585 = vsyncadd (!%p398_p7), %s270_s10, 4294967232  ;;  %p19_p4 = scmp.ge.s32.totalorder %s674_s23, 4   ;;  %s888_s12 = smov %s592_s13 }
  0x93   : > { %s889_s13 = smov %s596_s14  ;;  %s890_s14 = smov %s710_s11 }
  0x94   : > { %s891_s15 = smov %s674_s23  ;;  %21 = sbr.rel (!%p19_p4) target bundleno = 7 (0x7), region = 94 }
  0x9b   :  { %275 = vsyncpa [#allocation3], 1 }
  0x9c   :  { %277 = vsyncpa [#allocation3 + $0x1], 1 }
  0x9d   :  { %278 = vsyncpa [#allocation6], 1 }
  0x9e   :  { %280 = vsyncpa [#allocation6 + $0x1], 1 }
  0x9f   :  { %281 = vsyncpa [#allocation4], 1 }
  0xa0   :  { %283 = vsyncpa [#allocation4 + $0x1], 1 }

</bundles_post_ra>
